<compile_context>
chip_gen: v6e
topology: v6e:2x2x1
jax: 0.10.0
libtpu: 0.0.40
codegen_flags: <defaults>
</compile_context>

<pallas_src>
import jax
import jax.numpy as jnp
from jax.experimental import pallas as pl
from jax.experimental.pallas import tpu as pltpu

_GN_EPS = 1e-5  # nn.GroupNorm default eps


def _shuffle_attn_kernel(pa_ref, pb_ref, xa_ref, xb_ref, out_ref):
    """Process `bb` batch items x `nm` half-groups for both shuffle partners.

    pa_ref/pb_ref : (nm, Cg, 3)  folded per-channel params [a, bm, c]
    xa_ref/xb_ref : (bb, nm, Cg, HW)  half-groups m = p  /  m = G + p
    out_ref       : (bb, nm, Cg, 2*HW)  lanes [0,HW) <- A, [HW,2*HW) <- B
    """
    hw = xa_ref.shape[-1]

    def gated(x_ref, p_ref):
        x = x_ref[...].astype(jnp.float32)              # (bb, nm, Cg, HW)
        a = p_ref[:, :, 0:1][None]                      # (1, nm, Cg, 1)
        bm = p_ref[:, :, 1:2][None]
        c = p_ref[:, :, 2:3][None]

        # Per-channel stats over the spatial (lane) axis, single pass in f32.
        mean = jnp.mean(x, axis=-1, keepdims=True)
        ex2 = jnp.mean(x * x, axis=-1, keepdims=True)
        var = jnp.maximum(ex2 - mean * mean, 0.0)

        xn = (x - mean) * jax.lax.rsqrt(var + _GN_EPS)
        z = a * xn + (bm * mean + c)
        # sigmoid; exp lives on the EUP slot.  (If EUP ever binds on v7x, swap
        # for 0.5*jnp.tanh(0.5*z)+0.5 or pl.reciprocal(..., approx=True).)
        gate = 1.0 / (1.0 + jnp.exp(-z))
        return (x * gate).astype(out_ref.dtype)

    out_ref[:, :, :, 0:hw] = gated(xa_ref, pa_ref)
    out_ref[:, :, :, hw:2 * hw] = gated(xb_ref, pb_ref)


def _largest_divisor_leq(n, cap):
    cap = int(max(1, min(n, cap)))
    for d in range(cap, 0, -1):
        if n % d == 0:
            return d
    return 1


def shuffle_attention(x, params, G, *, target_block_bytes=2 * 1024 * 1024):
    """x: (b, C, H, W); params: (Cg, 6) = [cweight, cbias, sweight, sbias, gn_w, gn_b].

    Returns the same tensor as ShuffleAttention.forward (NCHW, post channel_shuffle).
    """
    b, C, H, W = x.shape
    assert C % (2 * G) == 0, "in_chan must be divisible by 2*G"
    cg = C // (2 * G)
    hw = H * W

    # ---- fold the two gating branches into one per-channel affine (a, bm, c) ----
    cw, cb, sw, sb, gw, gb = (params[:, i].astype(jnp.float32) for i in range(6))
    p_ch = jnp.stack([jnp.zeros_like(cw), cw, cb], axis=-1)                 # (Cg, 3)
    p_sp = jnp.stack([sw * gw, jnp.zeros_like(sw), sw * gb + sb], axis=-1)  # (Cg, 3)
    # half-group m: even -> channel-attention branch, odd -> GroupNorm branch.
    ptab = jnp.tile(jnp.stack([p_ch, p_sp], axis=0), (G, 1, 1))             # (2G, Cg, 3)

    # x viewed as (b, 2G half-groups, Cg, HW): free reshape of NCHW.
    xg = x.reshape(b, 2 * G, cg, hw)

    # ---- block sizing: ~target_block_bytes of (padded, f32) VMEM per input chunk ----
    cg_pad = ((cg + 7) // 8) * 8
    hw_pad = ((hw + 127) // 128) * 128
    row_bytes = cg_pad * hw_pad * 4                      # one half-group, one batch item
    nm = _largest_divisor_leq(G, max(1, target_block_bytes // row_bytes))
    bb = _largest_divisor_leq(b, max(1, target_block_bytes // (nm * row_bytes)))
    gp = G // nm
    grid = (b // bb, gp)

    out = pl.pallas_call(
        _shuffle_attn_kernel,
        out_shape=jax.ShapeDtypeStruct((b, G, cg, 2 * hw), x.dtype),
        grid=grid,
        in_specs=[
            pl.BlockSpec((nm, cg, 3), lambda bi, pi: (pi, 0, 0)),             # params A
            pl.BlockSpec((nm, cg, 3), lambda bi, pi: (gp + pi, 0, 0)),        # params B
            pl.BlockSpec((bb, nm, cg, hw), lambda bi, pi: (bi, pi, 0, 0)),    # x, m = p
            pl.BlockSpec((bb, nm, cg, hw), lambda bi, pi: (bi, gp + pi, 0, 0)),  # x, m = G+p
        ],
        out_specs=pl.BlockSpec((bb, nm, cg, 2 * hw), lambda bi, pi: (bi, pi, 0, 0)),
        compiler_params=pltpu.CompilerParams(
            dimension_semantics=("parallel", "parallel"),
            vmem_limit_bytes=48 * 1024 * 1024,  # headroom under v7x's 64 MiB/TC
        ),
    )(ptab, ptab, xg, xg)

    # (b, G, Cg, 2*HW) row-major == post-shuffle (b, C, H, W): free reshape.
    return out.reshape(b, C, H, W)


def _shuffle_attention_ref(x, params, G):
    """Pure-JAX reference mirroring the PyTorch forward, for verification."""
    b, C, H, W = x.shape
    cg = C // (2 * G)
    cw = params[:, 0].reshape(1, cg, 1, 1)
    cb = params[:, 1].reshape(1, cg, 1, 1)
    sw = params[:, 2].reshape(1, cg, 1, 1)
    sb = params[:, 3].reshape(1, cg, 1, 1)
    gw = params[:, 4].reshape(1, cg, 1, 1)
    gb = params[:, 5].reshape(1, cg, 1, 1)

    xg = x.reshape(b * G, 2 * cg, H, W)
    x0, x1 = xg[:, :cg], xg[:, cg:]

    x_channel = jnp.mean(x0, axis=(2, 3), keepdims=True)
    x_channel = x0 * jax.nn.sigmoid(cw * x_channel + cb)

    m1 = jnp.mean(x1, axis=(2, 3), keepdims=True)
    v1 = jnp.mean((x1 - m1) ** 2, axis=(2, 3), keepdims=True)
    xs = (x1 - m1) / jnp.sqrt(v1 + _GN_EPS) * gw + gb
    x_spatial = x1 * jax.nn.sigmoid(sw * xs + sb)

    out = jnp.concatenate([x_channel, x_spatial], axis=1).reshape(b, C, H, W)
    out = out.reshape(b, 2, C // 2, H, W).transpose(0, 2, 1, 3, 4).reshape(b, C, H, W)
    return out


if __name__ == "__main__":
    root = jax.random.PRNGKey(0)

    def run_case(key, b, in_chan, G, H, W, target_block_bytes=None):
        cg = in_chan // (2 * G)
        kx, kp = jax.random.split(key)
        x = jax.random.normal(kx, (b, in_chan, H, W), dtype=jnp.float32)
        # Deterministic, non-trivial (cweight, cbias, sweight, sbias, gn_w, gn_b).
        params = 0.5 * jax.random.normal(kp, (cg, 6), dtype=jnp.float32) + jnp.array(
            [0.0, 1.0, 0.0, 1.0, 1.0, 0.0], dtype=jnp.float32
        )
        kwargs = {} if target_block_bytes is None else {"target_block_bytes": target_block_bytes}
        out = jax.block_until_ready(shuffle_attention(x, params, G, **kwargs))
        ref = _shuffle_attention_ref(x, params, G)
        assert out.shape == x.shape
        assert bool(jnp.allclose(out, ref, atol=2e-5, rtol=2e-5)), (
            "mismatch vs JAX reference, max abs err "
            f"{float(jnp.max(jnp.abs(out - ref)))}"
        )

    k1, k2 = jax.random.split(root)
    # Small primary case (in_chan=32, G=4 -> Cg=4, 16x16 map, HW=256 lane-dense).
    # Tiny block target forces a multi-step grid so both index maps are exercised.
    run_case(k1, b=2, in_chan=32, G=4, H=16, W=16, target_block_bytes=8 * 1024)
    # Odd G and non-128-multiple spatial extent, default (single-block) tiling.
    run_case(k2, b=2, in_chan=24, G=3, H=7, W=9)
    print("KERNEL_OK")
</pallas_src>

<mosaic_0001>
module attributes {stable_mosaic.version = 11 : i64} {
  func.func @_shuffle_attn_kernel(%arg0: i32, %arg1: i32, %arg2: memref<1x4x3xf32, #tpu.memory_space<vmem>>, %arg3: memref<1x4x3xf32, #tpu.memory_space<vmem>>, %arg4: memref<1x1x4x256xf32, #tpu.memory_space<vmem>>, %arg5: memref<1x1x4x256xf32, #tpu.memory_space<vmem>>, %arg6: memref<1x1x4x512xf32, #tpu.memory_space<vmem>>) attributes {dimension_semantics = [#tpu.dimension_semantics<parallel>, #tpu.dimension_semantics<parallel>], iteration_bounds = array<i64: 2, 4>, scalar_prefetch = 0 : i64, scratch_operands = 0 : i64, tpu.core_type = #tpu.core_type<tc>, window_params = [{transform_indices = @transform_0, window_bounds = array<i64: 1, 4, 3>}, {transform_indices = @transform_1, window_bounds = array<i64: 1, 4, 3>}, {transform_indices = @transform_2, window_bounds = array<i64: 1, 1, 4, 256>}, {transform_indices = @transform_3, window_bounds = array<i64: 1, 1, 4, 256>}, {transform_indices = @transform_4, window_bounds = array<i64: 1, 1, 4, 512>}]} {
    %c0 = arith.constant 0 : index
    %c0_0 = arith.constant 0 : index
    %c0_1 = arith.constant 0 : index
    %c0_2 = arith.constant 0 : index
    %0 = vector.load %arg4[%c0, %c0_0, %c0_1, %c0_2] : memref<1x1x4x256xf32, #tpu.memory_space<vmem>>, vector<1x1x4x256xf32>
    %c0_3 = arith.constant 0 : index
    %c0_4 = arith.constant 0 : index
    %c0_5 = arith.constant 0 : index
    %1 = vector.load %arg2[%c0_3, %c0_4, %c0_5] : memref<1x4x3xf32, #tpu.memory_space<vmem>>, vector<1x4x1xf32>
    %2 = vector.shape_cast %1 : vector<1x4x1xf32> to vector<1x1x4x1xf32>
    %c0_6 = arith.constant 0 : index
    %c0_7 = arith.constant 0 : index
    %c1 = arith.constant 1 : index
    %3 = vector.load %arg2[%c0_6, %c0_7, %c1] : memref<1x4x3xf32, #tpu.memory_space<vmem>>, vector<1x4x1xf32>
    %4 = vector.shape_cast %3 : vector<1x4x1xf32> to vector<1x1x4x1xf32>
    %c0_8 = arith.constant 0 : index
    %c0_9 = arith.constant 0 : index
    %c2 = arith.constant 2 : index
    %5 = vector.load %arg2[%c0_8, %c0_9, %c2] : memref<1x4x3xf32, #tpu.memory_space<vmem>>, vector<1x4x1xf32>
    %6 = vector.shape_cast %5 : vector<1x4x1xf32> to vector<1x1x4x1xf32>
    %cst = arith.constant dense<0.000000e+00> : vector<1x1x4xf32>
    %7 = vector.multi_reduction <add>, %0, %cst [3] : vector<1x1x4x256xf32> to vector<1x1x4xf32>
    %8 = vector.shape_cast %7 : vector<1x1x4xf32> to vector<1x1x4x1xf32>
    %cst_10 = arith.constant 2.560000e+02 : f32
    %9 = vector.broadcast %cst_10 : f32 to vector<1x1x4x1xf32>
    %10 = arith.divf %8, %9 : vector<1x1x4x1xf32>
    %11 = arith.mulf %0, %0 : vector<1x1x4x256xf32>
    %cst_11 = arith.constant dense<0.000000e+00> : vector<1x1x4xf32>
    %12 = vector.multi_reduction <add>, %11, %cst_11 [3] : vector<1x1x4x256xf32> to vector<1x1x4xf32>
    %13 = vector.shape_cast %12 : vector<1x1x4xf32> to vector<1x1x4x1xf32>
    %cst_12 = arith.constant 2.560000e+02 : f32
    %14 = vector.broadcast %cst_12 : f32 to vector<1x1x4x1xf32>
    %15 = arith.divf %13, %14 : vector<1x1x4x1xf32>
    %16 = arith.mulf %10, %10 : vector<1x1x4x1xf32>
    %17 = arith.subf %15, %16 : vector<1x1x4x1xf32>
    %cst_13 = arith.constant 0.000000e+00 : f32
    %18 = vector.broadcast %cst_13 : f32 to vector<1x1x4x1xf32>
    %19 = arith.maximumf %17, %18 : vector<1x1x4x1xf32>
    %20 = vector.broadcast %10 : vector<1x1x4x1xf32> to vector<1x1x4x256xf32>
    %21 = arith.subf %0, %20 : vector<1x1x4x256xf32>
    %cst_14 = arith.constant 9.99999974E-6 : f32
    %22 = vector.broadcast %cst_14 : f32 to vector<1x1x4x1xf32>
    %23 = arith.addf %19, %22 : vector<1x1x4x1xf32>
    %24 = math.rsqrt %23 : vector<1x1x4x1xf32>
    %25 = vector.broadcast %24 : vector<1x1x4x1xf32> to vector<1x1x4x256xf32>
    %26 = arith.mulf %21, %25 : vector<1x1x4x256xf32>
    %27 = vector.broadcast %2 : vector<1x1x4x1xf32> to vector<1x1x4x256xf32>
    %28 = arith.mulf %27, %26 : vector<1x1x4x256xf32>
    %29 = arith.mulf %4, %10 : vector<1x1x4x1xf32>
    %30 = arith.addf %29, %6 : vector<1x1x4x1xf32>
    %31 = vector.broadcast %30 : vector<1x1x4x1xf32> to vector<1x1x4x256xf32>
    %32 = arith.addf %28, %31 : vector<1x1x4x256xf32>
    %cst_15 = arith.constant 0.000000e+00 : f32
    %33 = vector.broadcast %cst_15 : f32 to vector<1x1x4x256xf32>
    %34 = arith.subf %33, %32 : vector<1x1x4x256xf32>
    %35 = math.exp %34 : vector<1x1x4x256xf32>
    %cst_16 = arith.constant 1.000000e+00 : f32
    %36 = vector.broadcast %cst_16 : f32 to vector<1x1x4x256xf32>
    %37 = arith.addf %36, %35 : vector<1x1x4x256xf32>
    %cst_17 = arith.constant 1.000000e+00 : f32
    %38 = vector.broadcast %cst_17 : f32 to vector<1x1x4x256xf32>
    %39 = arith.divf %38, %37 : vector<1x1x4x256xf32>
    %40 = arith.mulf %0, %39 : vector<1x1x4x256xf32>
    %c0_18 = arith.constant 0 : index
    %c0_19 = arith.constant 0 : index
    %c0_20 = arith.constant 0 : index
    %c0_21 = arith.constant 0 : index
    %41 = vector.load %arg6[%c0_18, %c0_19, %c0_20, %c0_21] : memref<1x1x4x512xf32, #tpu.memory_space<vmem>>, vector<1x1x4x256xf32>
    tpu.vector_store %arg6[%c0_18, %c0_19, %c0_20, %c0_21], %40 {strides = array<i32>} : memref<1x1x4x512xf32, #tpu.memory_space<vmem>>, vector<1x1x4x256xf32>,
    %c0_22 = arith.constant 0 : index
    %c0_23 = arith.constant 0 : index
    %c0_24 = arith.constant 0 : index
    %c0_25 = arith.constant 0 : index
    %42 = vector.load %arg5[%c0_22, %c0_23, %c0_24, %c0_25] : memref<1x1x4x256xf32, #tpu.memory_space<vmem>>, vector<1x1x4x256xf32>
    %c0_26 = arith.constant 0 : index
    %c0_27 = arith.constant 0 : index
    %c0_28 = arith.constant 0 : index
    %43 = vector.load %arg3[%c0_26, %c0_27, %c0_28] : memref<1x4x3xf32, #tpu.memory_space<vmem>>, vector<1x4x1xf32>
    %44 = vector.shape_cast %43 : vector<1x4x1xf32> to vector<1x1x4x1xf32>
    %c0_29 = arith.constant 0 : index
    %c0_30 = arith.constant 0 : index
    %c1_31 = arith.constant 1 : index
    %45 = vector.load %arg3[%c0_29, %c0_30, %c1_31] : memref<1x4x3xf32, #tpu.memory_space<vmem>>, vector<1x4x1xf32>
    %46 = vector.shape_cast %45 : vector<1x4x1xf32> to vector<1x1x4x1xf32>
    %c0_32 = arith.constant 0 : index
    %c0_33 = arith.constant 0 : index
    %c2_34 = arith.constant 2 : index
    %47 = vector.load %arg3[%c0_32, %c0_33, %c2_34] : memref<1x4x3xf32, #tpu.memory_space<vmem>>, vector<1x4x1xf32>
    %48 = vector.shape_cast %47 : vector<1x4x1xf32> to vector<1x1x4x1xf32>
    %cst_35 = arith.constant dense<0.000000e+00> : vector<1x1x4xf32>
    %49 = vector.multi_reduction <add>, %42, %cst_35 [3] : vector<1x1x4x256xf32> to vector<1x1x4xf32>
    %50 = vector.shape_cast %49 : vector<1x1x4xf32> to vector<1x1x4x1xf32>
    %cst_36 = arith.constant 2.560000e+02 : f32
    %51 = vector.broadcast %cst_36 : f32 to vector<1x1x4x1xf32>
    %52 = arith.divf %50, %51 : vector<1x1x4x1xf32>
    %53 = arith.mulf %42, %42 : vector<1x1x4x256xf32>
    %cst_37 = arith.constant dense<0.000000e+00> : vector<1x1x4xf32>
    %54 = vector.multi_reduction <add>, %53, %cst_37 [3] : vector<1x1x4x256xf32> to vector<1x1x4xf32>
    %55 = vector.shape_cast %54 : vector<1x1x4xf32> to vector<1x1x4x1xf32>
    %cst_38 = arith.constant 2.560000e+02 : f32
    %56 = vector.broadcast %cst_38 : f32 to vector<1x1x4x1xf32>
    %57 = arith.divf %55, %56 : vector<1x1x4x1xf32>
    %58 = arith.mulf %52, %52 : vector<1x1x4x1xf32>
    %59 = arith.subf %57, %58 : vector<1x1x4x1xf32>
    %cst_39 = arith.constant 0.000000e+00 : f32
    %60 = vector.broadcast %cst_39 : f32 to vector<1x1x4x1xf32>
    %61 = arith.maximumf %59, %60 : vector<1x1x4x1xf32>
    %62 = vector.broadcast %52 : vector<1x1x4x1xf32> to vector<1x1x4x256xf32>
    %63 = arith.subf %42, %62 : vector<1x1x4x256xf32>
    %cst_40 = arith.constant 9.99999974E-6 : f32
    %64 = vector.broadcast %cst_40 : f32 to vector<1x1x4x1xf32>
    %65 = arith.addf %61, %64 : vector<1x1x4x1xf32>
    %66 = math.rsqrt %65 : vector<1x1x4x1xf32>
    %67 = vector.broadcast %66 : vector<1x1x4x1xf32> to vector<1x1x4x256xf32>
    %68 = arith.mulf %63, %67 : vector<1x1x4x256xf32>
    %69 = vector.broadcast %44 : vector<1x1x4x1xf32> to vector<1x1x4x256xf32>
    %70 = arith.mulf %69, %68 : vector<1x1x4x256xf32>
    %71 = arith.mulf %46, %52 : vector<1x1x4x1xf32>
    %72 = arith.addf %71, %48 : vector<1x1x4x1xf32>
    %73 = vector.broadcast %72 : vector<1x1x4x1xf32> to vector<1x1x4x256xf32>
    %74 = arith.addf %70, %73 : vector<1x1x4x256xf32>
    %cst_41 = arith.constant 0.000000e+00 : f32
    %75 = vector.broadcast %cst_41 : f32 to vector<1x1x4x256xf32>
    %76 = arith.subf %75, %74 : vector<1x1x4x256xf32>
    %77 = math.exp %76 : vector<1x1x4x256xf32>
    %cst_42 = arith.constant 1.000000e+00 : f32
    %78 = vector.broadcast %cst_42 : f32 to vector<1x1x4x256xf32>
    %79 = arith.addf %78, %77 : vector<1x1x4x256xf32>
    %cst_43 = arith.constant 1.000000e+00 : f32
    %80 = vector.broadcast %cst_43 : f32 to vector<1x1x4x256xf32>
    %81 = arith.divf %80, %79 : vector<1x1x4x256xf32>
    %82 = arith.mulf %42, %81 : vector<1x1x4x256xf32>
    %c0_44 = arith.constant 0 : index
    %c0_45 = arith.constant 0 : index
    %c0_46 = arith.constant 0 : index
    %c256 = arith.constant 256 : index
    %83 = vector.load %arg6[%c0_44, %c0_45, %c0_46, %c256] : memref<1x1x4x512xf32, #tpu.memory_space<vmem>>, vector<1x1x4x256xf32>
    tpu.vector_store %arg6[%c0_44, %c0_45, %c0_46, %c256], %82 {strides = array<i32>} : memref<1x1x4x512xf32, #tpu.memory_space<vmem>>, vector<1x1x4x256xf32>,
    return
  }
  func.func @transform_0(%arg0: i32, %arg1: i32) -> (i32, i32, i32) {
    %c0_i32 = arith.constant 0 : i32
    %c0_i32_0 = arith.constant 0 : i32
    %c0_i32_1 = arith.constant 0 : i32
    return %arg1, %c0_i32, %c0_i32_0 : i32, i32, i32
  }
  func.func @transform_1(%arg0: i32, %arg1: i32) -> (i32, i32, i32) {
    %c4_i32 = arith.constant 4 : i32
    %0 = arith.addi %c4_i32, %arg1 : i32
    %c0_i32 = arith.constant 0 : i32
    %c0_i32_0 = arith.constant 0 : i32
    %c0_i32_1 = arith.constant 0 : i32
    return %0, %c0_i32, %c0_i32_0 : i32, i32, i32
  }
  func.func @transform_2(%arg0: i32, %arg1: i32) -> (i32, i32, i32, i32) {
    %c0_i32 = arith.constant 0 : i32
    %c0_i32_0 = arith.constant 0 : i32
    %c0_i32_1 = arith.constant 0 : i32
    return %arg0, %arg1, %c0_i32, %c0_i32_0 : i32, i32, i32, i32
  }
  func.func @transform_3(%arg0: i32, %arg1: i32) -> (i32, i32, i32, i32) {
    %c4_i32 = arith.constant 4 : i32
    %0 = arith.addi %c4_i32, %arg1 : i32
    %c0_i32 = arith.constant 0 : i32
    %c0_i32_0 = arith.constant 0 : i32
    %c0_i32_1 = arith.constant 0 : i32
    return %arg0, %0, %c0_i32, %c0_i32_0 : i32, i32, i32, i32
  }
  func.func @transform_4(%arg0: i32, %arg1: i32) -> (i32, i32, i32, i32) {
    %c0_i32 = arith.constant 0 : i32
    %c0_i32_0 = arith.constant 0 : i32
    %c0_i32_1 = arith.constant 0 : i32
    return %arg0, %arg1, %c0_i32, %c0_i32_0 : i32, i32, i32, i32
  }
}

</mosaic_0001>

<bundles_post_ra>
// kernel: tpu_custom_call.1
= control target key start
LH: loop header
LB: loop body
LE: loop exit
PB: predicated region body
PF: predicated region fallthrough
CT: control target
= control target key end

     0   :  { %s1318_s0 = inlined_call_operand.vmem [shape: f32[8,4,3], index: 0, kind: input, shape index: {}]   ;;  %s1319_s1 = inlined_call_operand.vmem [shape: f32[8,4,3], index: 1, kind: input, shape index: {}]   ;;  %s1320_s2 = inlined_call_operand.hbm [shape: f32[2,8,4,256], index: 2, kind: input, shape index: {}]   ;;  %s1321_s3 = inlined_call_operand.hbm [shape: f32[2,8,4,256], index: 3, kind: input, shape index: {}]   ;;  %s1322_s4 = inlined_call_operand.hbm [shape: f32[2,4,4,512], index: 4, kind: output, shape index: {}]  }
   0x1   :  { %1330 = sst [smem:[#allocation16_spill]] %s1322_s4 }
   0x2   :  { %9 = vsyncpa [#allocation3], 0 }
   0x3   :  { %11 = vsyncpa [#allocation3 + $0x1], 0 }
   0x4   :  { %12 = vsyncpa [#allocation6], 0 }
   0x5   :  { %14 = vsyncpa [#allocation6 + $0x1], 0 }
   0x6   :  { %15 = vsyncpa [#allocation4], 0 }
   0x7   :  { %17 = vsyncpa [#allocation4 + $0x1], 0  ;;  %s1024_s15 = smov 0   ;;  %s1026_s16 = smov 0  }
   0x8   :  { %s1028_s17 = smov 0   ;;  %s1030_s18 = smov 0  }
   0x9   :  { %s1032_s19 = smov 0   ;;  %s1034_s20 = smov 0  }
   0xa   :  { %s1036_s21 = smov 0   ;;  %s1038_s22 = smov 0  }
   0xb   :  { %s1040_s23 = smov 0   ;;  %s1042_s24 = smov 0  }
   0xc   :  { %s1044_s25 = smov 0  }
   0xd LB: > { %1331 = sst [smem:[#allocation11_spill]] %s970_s20  ;;  %s648_s26 = sadd.s32 4294967295, %s990_s25   ;;  %s990_s25 = sphi %s1044_s25, %s23_s25   ;;  %s986_s24 = sphi %s1042_s24, %s1365_s24   ;;  %s982_s23 = sphi %s1040_s23, %s1364_s23   ;;  %s978_s22 = sphi %s1038_s22, %s1363_s22   ;;  %s974_s21 = sphi %s1036_s21, %s1362_s21   ;;  %s970_s20 = sphi %s1034_s20, %s1354_s20   ;;  %s966_s19 = sphi %s1032_s19, %s1361_s19   ;;  %s962_s18 = sphi %s1030_s18, %s1360_s18   ;;  %s958_s17 = sphi %s1028_s17, %s1359_s17   ;;  %s954_s16 = sphi %s1026_s16, %s1358_s16   ;;  %s950_s15 = sphi %s1024_s15, %s1357_s15  }
   0xe   : > { %1332 = sst [smem:[#allocation12_spill]] %s978_s22  ;;  %s649_s27 = sadd.s32 4294967294, %s990_s25  }
   0xf   : > { %s32_s28 = sadd.s32 1, %s982_s23  ;;  %s35_s29 = sadd.s32 1, %s986_s24 }
  0x10   : > { %p33_p0 = scmp.ge.s32.totalorder %s32_s28, 4  ;;  %s98_s30 = sadd.s32 1, %s970_s20 }
  0x11   : > { %p105_p1 = scmp.ne.s32.totalorder %s970_s20, %s966_s19  ;;  %p1327_p2 = scmp.eq.s32.totalorder %s990_s25, 0 }
  0x12   : > { %s1367_s28 = smov (%p33_p0, %s32_s28), 0  ;;  %s1369_s29 = smov (!%p33_p0, %s35_s29), %s986_s24 }
  0x13   : > { %1333 = sst [smem:[#allocation13_spill]] %s1367_s28  ;;  %s94_s5 = ssub.s32 %s982_s23, %s1367_s28 }
  0x14   : > { %p1097_p3 = por %p1327_p2, %p105_p1  ;;  %p37_p4 = scmp.ge.s32.totalorder %s1369_s29, 2 }
  0x15   : > { %p111_p5 = scmp.ne.s32.totalorder %s966_s19, %s962_s18  ;;  %p1103_p6 = scmp.eq.s32.totalorder %s648_s26, 0 }
  0x16   : > { %s121_s8 = sadd.s32 4, %s982_s23  ;;  %s1371_s29 = smov (%p37_p4, %s1369_s29), 0 }
  0x17   : > { %1336 = sst [smem:[#allocation14_spill]] %s1371_s29  ;;  %p1115_p7 = por %p1103_p6, %p111_p5 }
  0x18   : > { %s122_s10 = sadd.s32 4, %s1367_s28  ;;  %s93_s11 = ssub.s32 %s986_s24, %s1371_s29 }
  0x19   : > { %s124_s12 = ssub.s32 %s121_s8, %s122_s10  ;;  %s95_s13 = sor.u32 %s94_s5, %s93_s11 }
  0x1a   : > { %s125_s14 = sor.u32 %s124_s12, %s93_s11  ;;  %p96_p8 = scmp.eq.s32.totalorder %s95_s13, 0 }
  0x1b   : > { %p1122_p9 = scmp.eq.s32.totalorder %s125_s14, 0  ;;  %p167_p10 = scmp.eq.s32.totalorder %s648_s26, 7 }
  0x1c   : > { %p173_p11 = scmp.eq.s32.totalorder %s649_s27, 7  ;;  %p1329_p0 = scmp.lt.s32.totalorder %s990_s25, 8 }
  0x1d   : > { %s1127_s22 = scalar_select %p96_p8, %s970_s20, %s98_s30  }
  0x1e   : > { %p1132_p12 = por %p167_p10, %p105_p1  ;;  %p1139_p13 = por %p173_p11, %p111_p5 }
  0x1f   : > { %1339 = sst [smem:[#allocation15_spill]] %s1127_s22  ;;  %s209_s8 = sand.u32 1, %s970_s20  }
  0x20   : > { %s1340_s28 = scalar_select %p1132_p12, 1, 0 }
  0x21   : > { %s1341_s5 = scalar_select %p1139_p13, 1, 0 }
  0x22   : > { %s653_s26 = sshll.u32 %s982_s23, 1  ;;  %s652_s10 = sshll.u32 %s209_s8, 3 }
  0x23   : > { %s654_s11 = sshll.u32 %s986_s24, 4  ;;  %s213_s30 = scalar_lea.vmem [#allocation2], %s652_s10 }
  0x24   : > { %s1147_s27 = sadd.s32 %s654_s11, %s653_s26  ;;  %s223_s12 = sshll.u32 %s213_s30, 4  ;;  %s224_s12 = int_to_ptr.vmem [resolvable:$true] %s223_s12 }
  0x25   : > { %s655_s13 = sshll.u32 %s1147_s27, 6  ;;  %p1159_p1 = pnand %p1329_p0, %p1097_p3 }
  0x26   : > { %s221_s22 = scalar_lea.hbm %s1320_s2, %s655_s13  ;;  %p660_p4 = scmp.ge.s32.totalorder %s990_s25, 1 }
  0x27   : > { %p250_p5 = scmp.lt.s32.totalorder %s990_s25, 9  ;;  %s210_s26 = scalar_lea.sflag [#allocation3], %s209_s8 }
  0x28   : > { %p811_p8 = pneg %p1159_p1  ;;  %s822_s10 = scalar_lea.vmem %s224_s12, 128 }
  0x29   : > { %p823_p10 = scmp.ne.s32.totalorder %s224_s12, %s822_s10  ;;  %s992_s11 = smov [#allocation2]  }
  0x2a   : > { %s827_s30 = sshll.u32 %s992_s11, 4  ;;  %s828_s30 = int_to_ptr.vmem [resolvable:$false] %s827_s30 }
  0x2b   : > { %p825_p11 = pnand %p823_p10, %p811_p8  ;;  %s829_s29 = scalar_lea.vmem %s828_s30, 256 }
  0x2c   : > { %p830_p13 = scmp.lt.s32.totalorder %s224_s12, %s828_s30  ;;  %p831_p12 = scmp.lt.s32.totalorder %s829_s29, %s822_s10 }
  0x2d   : > { %p826_p2 = pneg %p825_p11 }
  0x2e   : > { %p832_p3 = por %p831_p12, %p830_p13 }
  0x30   : > { %p833_p0 = pnand %p832_p3, %p826_p2 }
  0x32   : > { %836 = shalt.err (!%p833_p0)
}
  0x33   : > { %681 = dma.hbm_to_vmem [thread:$0]  (!%p1159_p1), %s221_s22, 128, %s224_s12, %s210_s26  }
  0x34   : > { %p1173_p2 = pnand %p660_p4, %p250_p5  ;;  %s128_s20 = sadd.s32 1, %s958_s17 }
  0x35   : > { %p135_p12 = scmp.ne.s32.totalorder %s958_s17, %s954_s16  ;;  %p1344_p13 = scmp.eq.s32.totalorder %s990_s25, 0 }
  0x36   : > { %s1183_s8 = scalar_select %p1122_p9, %s958_s17, %s128_s20  }
  0x37   : > { %p137_p0 = por %p135_p12, %p1344_p13  ;;  %p141_p8 = scmp.ne.s32.totalorder %s954_s16, %s950_s15 }
  0x38   : > { %s230_s14 = sand.u32 1, %s958_s17   ;;  %s556_s22 = scalar_lea.hbm %s1321_s3, %s655_s13 }
  0x39   : > { %p1197_p1 = por %p141_p8, %p1103_p6  ;;  %s656_s26 = sshll.u32 %s230_s14, 3 }
  0x3a   : > { %s557_s30 = scalar_lea.hbm %s556_s22, 512  ;;  %p1346_p4 = scmp.lt.s32.totalorder %s990_s25, 8 }
  0x3b   : > { %s234_s15 = scalar_lea.vmem [#allocation5], %s656_s26  ;;  %s231_s27 = scalar_lea.sflag [#allocation6], %s230_s14 }
  0x3c   : > { %p1203_p5 = pnand %p1346_p4, %p137_p0  ;;  %s245_s29 = sshll.u32 %s234_s15, 4  ;;  %s246_s29 = int_to_ptr.vmem [resolvable:$true] %s245_s29 }
  0x3d   : > { %s850_s13 = scalar_lea.vmem %s246_s29, 128  ;;  %s993_s7 = smov [#allocation5]  }
  0x3e   : > { %p839_p9 = pneg %p1203_p5  ;;  %p851_p10 = scmp.ne.s32.totalorder %s246_s29, %s850_s13 }
  0x3f   : > { %s855_s20 = sshll.u32 %s993_s7, 4  ;;  %s856_s20 = int_to_ptr.vmem [resolvable:$false] %s855_s20 }
  0x40   : > { %p853_p6 = pnand %p851_p10, %p839_p9  ;;  %s857_s10 = scalar_lea.vmem %s856_s20, 256 }
  0x41   : > { %p858_p3 = scmp.lt.s32.totalorder %s246_s29, %s856_s20  ;;  %p859_p12 = scmp.lt.s32.totalorder %s857_s10, %s850_s13 }
  0x42   : > { %p854_p11 = pneg %p853_p6 }
  0x43   : > { %p860_p13 = por %p859_p12, %p858_p3 }
  0x45   : > { %p861_p0 = pnand %p860_p13, %p854_p11 }
  0x47   : > { %864 = shalt.err (!%p861_p0)
}
  0x48   : > { %684 = dma.hbm_to_vmem [thread:$0]  (!%p1203_p5), %s557_s30, 128, %s246_s29, %s231_s27  }
  0x49   : > { %254 = sbr.rel (%p1173_p2) target bundleno = 415 (0x19f), region = 36  ;;  %s1214_s14 = sand.u32 (!%p1173_p2), 1, %s966_s19  }
  0x4a   : > { %s661_s11 = sshll.u32 (!%p1173_p2), %s1214_s14, 3  ;;  %s257_s22 = scalar_lea.sflag (!%p1173_p2), [#allocation3], %s1214_s14 }
  0x4b   : > { %s260_s26 = scalar_lea.vmem (!%p1173_p2), [#allocation2], %s661_s11 }
  0x4e   : > { %937 = dma.done.wait (%p1115_p7), %s257_s22, 128  }
  0x4f   : > { %939 = vsyncadd (%p1115_p7), %s257_s22, 4294967168  ;;  %s265_s30 = sand.u32 1, %s954_s16  }
  0x50   : > { %s662_s4 = sshll.u32 %s265_s30, 3  ;;  %s266_s6 = scalar_lea.sflag [#allocation6], %s265_s30 }
  0x51   : > { %s269_s15 = scalar_lea.vmem [#allocation5], %s662_s4 }
  0x52   : > { %941 = dma.done.wait (%p1197_p1), %s266_s6, 128  }
  0x53   : > { %943 = vsyncadd (%p1197_p1), %s266_s6, 4294967168  ;;  %p308_p2 = scmp.lt.s32.totalorder %s974_s21, 7  ;;  %s312_s29 = sadd.s32 4, %s974_s21  ;;  %v994_v0 = vmov 0   ;;  %vm324_vm0 = vcmask 1043456   ;;  %v1233_v2 = vld [vmem:[%s260_s26] sm:$0xff]  ;;  %v349_v48 = vlaneseq }
  0x54   : > { %783 = vset.pattern.permute.xlu0 %v994_v0  ;;  %784 = vset.pattern.permute.xlu1 %v994_v0  ;;  %p313_p7 = scmp.lt.s32.totalorder %s312_s29, 7  ;;  %v1235_v3 = vld [vmem:[%s269_s15] sm:$0xff]  ;;  %s995_s12 = smov 127   ;;  %v322_v4 = vcombine.high %v1233_v2, %v1233_v2  ;;  %v325_v5 = vsel %vm324_vm0, %v1233_v2, 0.0  ;;  %v332_v7 = vmul.f32 %v1233_v2, %v1233_v2  ;;  %v996_v23 = vmov 1  }
  0x55   : > { %s309_s9 = scalar_select %p308_p2, %s974_s21, 7  ;;  %v410_v6 = vcombine.high %v1235_v3, %v1235_v3  ;;  %v412_v10 = vsel %vm324_vm0, %v1235_v3, 0.0  ;;  %v418_v18 = vmul.f32 %v1235_v3, %v1235_v3  ;;  %v997_v46 = vmov 839922192  }
  0x56   : > { %s1373_s29 = smov (!%p313_p7, %s312_s29), 7  ;;  %v326_v9 = vsel %vm324_vm0, %v322_v4, 0.0  ;;  %v334_v13 = vcombine.high %v332_v7, %v332_v7  ;;  %v336_v15 = vsel %vm324_vm0, %v332_v7, 0.0  ;;  %v347_v47 = vunpack.c.l.s4 %v997_v46  ;;  %s1348_s26 = sld [smem:[#allocation12_spill]] }
  0x57   : > { %s664_s27 = sshll.u32 %s309_s9, 2  ;;  %s665_s10 = sshll.u32 %s1373_s29, 2  ;;  %v413_v11 = vsel %vm324_vm0, %v410_v6, 0.0  ;;  %v327_v12 = vadd.f32 %v326_v9, %v325_v5  ;;  %v420_v19 = vcombine.high %v418_v18, %v418_v18  ;;  %v422_v20 = vsel %vm324_vm0, %v418_v18, 0.0 }
  0x58   : > { %s311_s20 = scalar_lea.vmem %s1318_s0, %s664_s27  ;;  %s316_s30 = scalar_lea.vmem %s1319_s1, %s665_s10  ;;  %v414_v14 = vadd.f32 %v413_v11, %v412_v10  ;;  %v337_v16 = vsel %vm324_vm0, %v334_v13, 0.0  ;;  %v348_v49 = vunpack.c.0.s8 %v347_v47  ;;  %v350_v50 = vshrl.u32 %v349_v48, 7 }
  0x59   : > { %v320_v1 = vld [vmem:[%s311_s20] sm:$0xf]  ;;  %328 = vadd.xlane.f32.xlu0 %v327_v12  ;;  %v338_v17 = vadd.f32 %v337_v16, %v336_v15  ;;  %v423_v21 = vsel %vm324_vm0, %v420_v19, 0.0  ;;  %s667_s4 = sshll.u32 %s974_s21, 2  ;;  %s663_s15 = sshll.u32 %s1214_s14, 4 }
  0x5a   : > { %378 = vrot.lane.b32.xlu1 %v320_v1, %s995_s12  ;;  %v408_v8 = vld [vmem:[%s316_s30] sm:$0xf]  ;;  %v424_v22 = vadd.f32 %v423_v21, %v422_v20  ;;  %v351_v51 = vsub.s32 %v348_v49, %v350_v50  ;;  %s307_s27 = scalar_lea.vmem [#allocation7], %s663_s15  ;;  %s1349_s20 = sld [smem:[#allocation16_spill]] }
  0x5b   : > { %s510_s13 = sshll.u32 %s307_s27, 4  ;;  %s494_s11 = scalar_lea.sflag [#allocation4], %s1214_s14  ;;  %s511_s13 = int_to_ptr.vmem [resolvable:$true] %s510_s13 }
  0x5c   : > { %s668_s6 = sshll.u32 %s1348_s26, 4  ;;  %s866_s22 = scalar_lea.vmem %s511_s13, 256 }
  0x5d   : > { %415 = vadd.xlane.f32.xlu0 %v414_v14  ;;  %s506_s29 = sadd.s32 %s668_s6, %s667_s4  ;;  %p867_p8 = scmp.ne.s32.totalorder %s511_s13, %s866_s22 }
  0x5e   : > { %464 = vrot.lane.b32.xlu1 %v408_v8, %s995_s12  ;;  %s669_s9 = sshll.u32 %s506_s29, 6  ;;  %p1351_p1 = scmp.ne.s32.totalorder %s1340_s28, 0 }
  0x5f   : > { %s998_s30 = smov [#allocation7]  }
  0x60   : > { %s1350_s12 = smov %s1349_s20  ;;  %s508_s10 = scalar_lea.hbm %s1349_s20, %s669_s9 }
  0x61   : > { %339 = vadd.xlane.f32.xlu0 %v338_v17  ;;  %p868_p4 = pnand %p867_p8, %p1351_p1  ;;  %s870_s26 = sshll.u32 %s998_s30, 4  ;;  %s871_s26 = int_to_ptr.vmem [resolvable:$false] %s870_s26 }
  0x62   : > { %s872_s4 = scalar_lea.vmem %s871_s26, 512  ;;  %p873_p9 = scmp.lt.s32.totalorder %s511_s13, %s871_s26 }
  0x63   : > { %p869_p5 = pneg %p868_p4  ;;  %p874_p10 = scmp.lt.s32.totalorder %s872_s4, %s866_s22 }
  0x65   : > { %p875_p6 = por %p874_p10, %p873_p9 }
  0x67   : > { %p876_p11 = pnand %p875_p6, %p869_p5 }
  0x77   : > { %369 = vperm.xlu0 %783, %v320_v1  }
  0x7b   : > { %785 = vset.pattern.permute.xlu0 %v996_v23 }
  0x82   : > { %425 = vadd.xlane.f32.xlu1 %v424_v22 }
  0x93   : > { %455 = vperm.xlu1 %784, %v408_v8  }
  0x97   : > { %786 = vset.pattern.permute.xlu1 %v996_v23 }
  0xcc   : > { %v379_v25 = vpop.permute.xlu1 %378 }
  0xd0   : > { %v465_v31 = vpop.permute.xlu1 %464 }
  0xe2   : > { %v329_v24 = vpop.xlane.xlu0 %328 }
  0xe3   : > { %v331_v26 = vmul.f32 0.00390625, %v329_v24 }
  0xe5   : > { %v377_v27 = vmul.f32 %v331_v26, %v320_v1  ;;  %v342_v37 = vmul.f32 %v331_v26, %v331_v26  ;;  %v352_v53 = vrot.slane %v331_v26, %v351_v51 }
  0xe6   : > { %v416_v28 = vpop.xlane.xlu0 %415 }
  0xe7   : > { %v381_v29 = vadd.f32 %v379_v25, %v377_v27  ;;  %v417_v30 = vmul.f32 0.00390625, %v416_v28  ;;  %v354_v57 = vsub.f32 %v1233_v2, %v352_v53 }
  0xe9   : > { %384 = vperm.xlu0 %785, %v381_v29   ;;  %v463_v32 = vmul.f32 %v417_v30, %v408_v8  ;;  %v428_v40 = vmul.f32 %v417_v30, %v417_v30  ;;  %v438_v56 = vrot.slane %v417_v30, %v351_v51 }
  0xea   : > { %v340_v34 = vpop.xlane.xlu0 %339 }
  0xeb   : > { %v467_v33 = vadd.f32 %v465_v31, %v463_v32  ;;  %v341_v35 = vmul.f32 0.00390625, %v340_v34  ;;  %v440_v60 = vsub.f32 %v1235_v3, %v438_v56 }
  0xed   : > { %470 = vperm.xlu1 %786, %v467_v33   ;;  %v343_v38 = vsub.f32 %v341_v35, %v342_v37 }
  0xef   : > { %v344_v41 = vmax.f32 %v343_v38, 0.0 }
  0xf1   : > { %v355_v43 = vadd.f32 1e-05, %v344_v41 }
  0xf2   : > { %v370_v63 = vpop.permute.xlu0 %369 }
  0xf3   : > { %789 = vrsqrt.f32 %v355_v43 }
 0x100   : > { %v790_v52 = vpop.eup %789 }
 0x101   : > { %v364_v54 = vrot.slane %v790_v52, %v351_v51 }
 0x103   : > { %v366_v58 = vmul.f32 %v364_v54, %v354_v57 }
 0x105   : > { %v373_v61 = vcombine.high %v366_v58, %v366_v58  ;;  %v375_v0 = vmul.f32 %v370_v63, %v366_v58 }
 0x107   : > { %v376_v1 = vmul.f32 %v373_v61, %v370_v63 }
 0x10b   : > { %v426_v36 = vpop.xlane.xlu1 %425 }
 0x10c   : > { %v427_v39 = vmul.f32 0.00390625, %v426_v36 }
 0x10e   : > { %v429_v42 = vsub.f32 %v427_v39, %v428_v40 }
 0x10f   : > { %v456_v5 = vpop.permute.xlu1 %455 }
 0x110   : > { %v430_v44 = vmax.f32 %v429_v42, 0.0 }
 0x112   : > { %v441_v45 = vadd.f32 1e-05, %v430_v44 }
 0x114   : > { %791 = vrsqrt.f32 %v441_v45 }
 0x121   : > { %v792_v55 = vpop.eup %791 }
 0x122   : > { %v450_v59 = vrot.slane %v792_v55, %v351_v51 }
 0x124   : > { %v452_v62 = vmul.f32 %v450_v59, %v440_v60 }
 0x126   : > { %v459_v4 = vcombine.high %v452_v62, %v452_v62  ;;  %v461_v9 = vmul.f32 %v456_v5, %v452_v62 }
 0x128   : > { %v462_v10 = vmul.f32 %v459_v4, %v456_v5 }
 0x164   : > { %v385_v6 = vpop.permute.xlu0 %384 }
 0x165   : > { %v387_v7 = vadd.f32 %v385_v6, %v375_v0  ;;  %v388_v8 = vadd.f32 %v385_v6, %v376_v1 }
 0x167   : > { %v389_v11 = vsub.f32 0.0, %v387_v7  ;;  %v390_v12 = vsub.f32 0.0, %v388_v8 }
 0x168   : > { %v471_v13 = vpop.permute.xlu1 %470 }
 0x169   : > { %v391_v14 = vmul.f32 1.442695, %v389_v11  ;;  %v393_v15 = vmul.f32 1.442695, %v390_v12  ;;  %v473_v16 = vadd.f32 %v471_v13, %v461_v9  ;;  %v474_v17 = vadd.f32 %v471_v13, %v462_v10 }
 0x16b   : > { %793 = vpow2.f32 %v391_v14  ;;  %v475_v18 = vsub.f32 0.0, %v473_v16  ;;  %v476_v19 = vsub.f32 0.0, %v474_v17 }
 0x16c   : > { %795 = vpow2.f32 %v393_v15 }
 0x16d   : > { %v477_v20 = vmul.f32 1.442695, %v475_v18  ;;  %v479_v21 = vmul.f32 1.442695, %v476_v19 }
 0x16f   : > { %797 = vpow2.f32 %v477_v20 }
 0x170   : > { %799 = vpow2.f32 %v479_v21 }
 0x178   : > { %v794_v22 = vpop.eup %793 }
 0x179   : > { %v796_v23 = vpop.eup %795  ;;  %v395_v24 = vadd.f32 1.0, %v794_v22 }
 0x17a   : > { %v396_v25 = vadd.f32 1.0, %v796_v23 }
 0x17b   : > { %801 = vrcp.f32 %v395_v24 }
 0x17c   : > { %v798_v26 = vpop.eup %797  ;;  %803 = vrcp.f32 %v396_v25 }
 0x17d   : > { %v800_v27 = vpop.eup %799  ;;  %v481_v28 = vadd.f32 1.0, %v798_v26 }
 0x17e   : > { %v482_v29 = vadd.f32 1.0, %v800_v27 }
 0x17f   : > { %805 = vrcp.f32 %v481_v28 }
 0x180   : > { %807 = vrcp.f32 %v482_v29 }
 0x188   : > { %v802_v30 = vpop.eup %801 }
 0x189   : > { %v804_v31 = vpop.eup %803 }
 0x18a   : > { %v403_v32 = vcombine.low %v802_v30, %v804_v31 }
 0x18c   : > { %v806_v33 = vpop.eup %805  ;;  %v405_v34 = vmul.f32 %v403_v32, %v1233_v2 }
 0x18d   : > { %v808_v35 = vpop.eup %807 }
 0x18e   : > { %406 = vst [vmem:[%s307_s27] sm:$0xff] %v405_v34  ;;  %v489_v36 = vcombine.low %v806_v33, %v808_v35 }
 0x190   : > { %v491_v37 = vmul.f32 %v489_v36, %v1235_v3 }
 0x192   : > { %492 = vst [vmem:[%s307_s27 + $0x8] sm:$0xff] %v491_v37 }
 0x193   : > { %879 = shalt.err (!%p876_p11)
}
 0x194   : > { %s880_s6 = scalar_lea.hbm %s508_s10, 256  ;;  %s884_s29 = scalar_lea.hbm %s1350_s12, 2048 }
 0x195   : > { %p881_p3 = scmp.ne.s32.totalorder %s508_s10, %s880_s6  ;;  %p885_p0 = scmp.lt.s32.totalorder %s508_s10, %s1350_s12 }
 0x196   : > { %p886_p2 = scmp.lt.s32.totalorder %s884_s29, %s880_s6 }
 0x197   : > { %p882_p12 = pnand %p881_p3, %p1351_p1 }
 0x198   : > { %p887_p7 = por %p886_p2, %p885_p0 }
 0x199   : > { %p883_p13 = pneg %p882_p12 }
 0x19b   : > { %p888_p8 = pnand %p887_p7, %p883_p13 }
 0x19d   : > { %891 = shalt.err (!%p888_p8)
}
 0x19e   : > { %676 = dma.vmem_to_hbm [thread:$0]  (%p1351_p1), %s511_s13, 256, %s508_s10, %s494_s11  }
 0x19f PF: > { %p690_p4 = scmp.ge.s32.totalorder %s990_s25, 2  ;;  %s522_s21 = sand.u32 1, %s962_s18  }
 0x1a0   : > { %p1352_p5 = scmp.ne.s32.totalorder %s1341_s5, 0  ;;  %s523_s7 = scalar_lea.sflag [#allocation4], %s522_s21 }
 0x1a2   : > { %p686_p9 = pnand %p690_p4, %p1352_p5 }
 0x1a4   : > { %p687_p10 = pneg %p686_p9 }
 0x1a6   : > { %945 = dma.done.wait (%p687_p10), %s523_s7, 256  }
 0x1a7   : > { %947 = vsyncadd (%p687_p10), %s523_s7, 4294967040  ;;  %s23_s25 = sadd.s32 1, %s990_s25   ;;  %s1353_s28 = sld [smem:[#allocation11_spill]] }
 0x1a8   : > { %p20_p6 = scmp.ge.s32.totalorder %s23_s25, 10   ;;  %s1354_s20 = sld [smem:[#allocation15_spill]] }
 0x1a9   : > { %s1355_s13 = sld [smem:[#allocation13_spill]]  ;;  %s1357_s15 = smov %s954_s16 }
 0x1aa   : > { %s1356_s10 = sld [smem:[#allocation14_spill]]  ;;  %s1358_s16 = smov %s958_s17 }
 0x1ab   : > { %s1359_s17 = smov %s1183_s8  ;;  %s1360_s18 = smov %s966_s19 }
 0x1ac   : > { %s1362_s21 = smov %s982_s23  ;;  %s1363_s22 = smov %s986_s24 }
 0x1ad   : > { %s1361_s19 = smov %s1353_s28  ;;  %22 = sbr.rel (!%p20_p6) target bundleno = 13 (0xd), region = 100 }
 0x1af   : > { %s1364_s23 = smov %s1355_s13 }
 0x1b0   : > { %s1365_s24 = smov %s1356_s10 }
 0x1b2   :  { %528 = vsyncpa [#allocation3], 1 }
 0x1b3   :  { %530 = vsyncpa [#allocation3 + $0x1], 1 }
 0x1b4   :  { %531 = vsyncpa [#allocation6], 1 }
 0x1b5   :  { %533 = vsyncpa [#allocation6 + $0x1], 1 }
 0x1b6   :  { %534 = vsyncpa [#allocation4], 1 }
 0x1b7   :  { %536 = vsyncpa [#allocation4 + $0x1], 1 }

</bundles_post_ra>
